<compile_context>
chip_gen: v5e
topology: v5e:2x2
jax: 0.10.0
libtpu: 0.0.40
codegen_flags: <defaults>
</compile_context>

<pallas_src>
from collections import OrderedDict

import jax
import jax.numpy as jnp
from jax.experimental import pallas as pl
from jax.experimental.pallas import tpu as pltpu


# ------------------------------ device-driven knobs ------------------------------ #

def _device_kind():
    try:
        return jax.devices()[0].device_kind.lower()
    except Exception:
        return ""


def _roll_matches_np_roll():
    """One-time probe of pltpu.roll's rotation convention (np.roll convention:
    positive shift moves elements toward higher lane indices). Keeps the conv
    tap shifts correct regardless of the installed lowering's convention."""
    def k(x_ref, o_ref):
        o_ref[...] = pltpu.roll(x_ref[...], 1, axis=1)
    x = jnp.tile(jnp.arange(128, dtype=jnp.float32)[None, :], (8, 1))
    y = pl.pallas_call(k, out_shape=jax.ShapeDtypeStruct((8, 128), jnp.float32))(x)
    return bool(y[0, 1] == x[0, 0])


# ---------------------- fused get_intermediate_layers (forward) ------------------ #

def make_get_intermediate_layers(backbone, return_layers, input_shape):
    """Build the fused Pallas forward for get_intermediate_layers.

    `backbone` is an OrderedDict of named children, each either
        ("conv3x3", weight (Cout,Cin,3,3), bias (Cout,))  or  ("relu",).
    """
    N, C0, H, W = input_shape
    M = H * W

    kind = _device_kind()
    # v7x: 2 TensorCores/chip -> 2 "parallel" grid blocks. v5e/v6e: 1 TC -> one
    # block covering the whole batch (no per-step overhead, no weight re-push).
    num_blocks = 2 if "v7" in kind else 1
    if num_blocks > N or N % num_blocks != 0 or ((N // num_blocks) * M) % 128 != 0:
        num_blocks = 1
    B_blk = N // num_blocks
    L_blk = B_blk * M
    # v5e has no native bf16 VPU lanes -> keep elementwise work in f32 there;
    # v6e/v7x are bf16-native -> bf16-resident activation chain.
    ew_dtype = jnp.float32 if ("v5 lite" in kind or "v5e" in kind) else jnp.bfloat16

    roll_np = _roll_matches_np_roll()

    # ---- host-side prep: im2col weights with bias folded in, plus tap masks ----
    conv_w = []        # per conv: (Cout, 1 + 9*Cin) bf16 = [bias | tap0 | ... | tap8]
    captures = []      # (output key, channels) in traversal order
    c = C0
    for name, spec in backbone.items():
        mkind = spec[0]
        if mkind == "conv3x3":
            w, b = spec[1], spec[2]
            cout, cin = w.shape[0], w.shape[1]
            assert cin == c and w.shape[2:] == (3, 3)
            w2d = jnp.transpose(w, (0, 2, 3, 1)).reshape(cout, 9 * cin)   # tap-major
            w2d = jnp.concatenate([b.reshape(cout, 1), w2d], axis=1)      # bias col 0
            conv_w.append(w2d.astype(jnp.bfloat16))
            c = cout
        elif mkind == "relu":
            pass
        else:
            # TODO(synk): only Conv2d(k=3,s=1,p=1) and ReLU children are lowered.
            raise NotImplementedError(f"unsupported child module: {name} ({mkind})")
        if name in return_layers:
            captures.append((return_layers[name], c))

    n_conv = len(conv_w)

    # 9 per-tap boundary masks, precomputed once (hoisted out of the kernel) and
    # tiled across the B_blk images that share a block's lane axis. They zero
    # both out-of-image taps and any cross-image / wraparound lanes of the roll.
    p = jnp.arange(M)
    h0, w0 = p // W, p % W
    mrows = []
    for di in range(3):
        for dj in range(3):
            hh, ww = h0 + (di - 1), w0 + (dj - 1)
            mrows.append((hh >= 0) & (hh < H) & (ww >= 0) & (ww < W))
    mask_blk = jnp.tile(jnp.stack(mrows).astype(ew_dtype), (1, B_blk))     # (9, L_blk)

    # Tap lane shift: output pixel p reads input pixel p + s within its image.
    shifts = [(di - 1) * W + (dj - 1) for di in range(3) for dj in range(3)]

    def kernel(x_ref, mask_ref, *rest):
        w_refs = rest[:n_conv]
        out_refs = rest[n_conv:]
        L = x_ref.shape[1]
        masks = mask_ref[...]                       # (9, L) ew_dtype
        ones_row = jnp.ones((1, L), ew_dtype)       # bias lane of the im2col tile

        def conv3x3(a_ew, w_ref):
            # im2col: 9 rolled+masked (Cin, L) slabs + ones-row, concatenated on
            # sublanes -> ONE MXU matmul, K = 1 + 9*Cin, f32 accumulation.
            slabs = [ones_row]
            for t, s in enumerate(shifts):
                amt = ((-s) if roll_np else s) % L
                sl = a_ew if amt == 0 else pltpu.roll(a_ew, amt, axis=1)   # XLU
                if s != 0:
                    sl = sl * masks[t:t + 1, :]
                slabs.append(sl)
            patches = jnp.concatenate(slabs, axis=0).astype(jnp.bfloat16)
            return jnp.dot(w_ref[...], patches, preferred_element_type=jnp.float32)

        # This loop IS the PyTorch forward: apply children in order, capture the
        # ones named in return_layers. Unrolled at trace time, all in VMEM.
        a = x_ref[...].astype(ew_dtype)             # (C, L), lanes = B_blk*H*W
        ci = oi = 0
        for name, spec in backbone.items():
            if spec[0] == "conv3x3":
                y = conv3x3(a, w_refs[ci]); ci += 1
                cap = y                             # f32 conv output for capture
                a = y.astype(ew_dtype)
            elif spec[0] == "relu":
                a = jnp.maximum(a, 0)               # fused epilogue (ew_dtype)
                cap = a
            if name in return_layers:
                out_refs[oi][...] = cap.astype(out_refs[oi].dtype)  # lane-dense store
                oi += 1

    in_specs = [
        pl.BlockSpec((C0, L_blk), lambda g: (0, g)),   # activations: batch on lanes
        pl.BlockSpec((9, L_blk), lambda g: (0, 0)),    # tap masks (shared per block)
    ]
    for w2d in conv_w:
        in_specs.append(pl.BlockSpec(w2d.shape, lambda g: (0, 0)))
    out_specs = [pl.BlockSpec((ch, L_blk), lambda g: (0, g)) for _, ch in captures]
    out_shape = [jax.ShapeDtypeStruct((ch, N * M), jnp.float32) for _, ch in captures]

    fused = pl.pallas_call(
        kernel,
        out_shape=out_shape,
        grid=(num_blocks,),
        in_specs=in_specs,
        out_specs=out_specs,
        compiler_params=pltpu.CompilerParams(dimension_semantics=("parallel",)),
    )

    def forward(x_nchw):
        # (N,C,H,W) -> (C, N*H*W): channels on sublanes, batch folded into lanes.
        # The tiny transpose is wrapper-side layout plumbing (runs in XLA).
        x_cl = jnp.transpose(x_nchw.reshape(N, C0, M), (1, 0, 2)).reshape(C0, N * M)
        outs = fused(x_cl, mask_blk, *conv_w)
        return {key: jnp.transpose(o.reshape(ch, N, H, W), (1, 0, 2, 3))
                for (key, ch), o in zip(captures, outs)}

    return forward


# ------------------------------------- driver ------------------------------------ #

def _init_conv_params(key, cout, cin, k=3):
    kw_, kb_ = jax.random.split(key)
    bound = float(cin * k * k) ** -0.5
    w = jax.random.uniform(kw_, (cout, cin, k, k), jnp.float32, -bound, bound)
    b = jax.random.uniform(kb_, (cout,), jnp.float32, -bound, bound)
    return w, b


def _conv_ref(x, w, b):
    # Pure-JAX f32 reference conv (NCHW, OIHW) for the correctness check.
    y = jax.lax.conv_general_dilated(
        x, w, window_strides=(1, 1), padding=((1, 1), (1, 1)),
        dimension_numbers=("NCHW", "OIHW", "NCHW"))
    return y + b.reshape(1, -1, 1, 1)


if __name__ == "__main__":
    key = jax.random.PRNGKey(0)
    kx, k1, k2, k3 = jax.random.split(key, 4)

    # NCHW input consistent with a small CNN backbone: (2, 4, 16, 16)
    x = jax.random.normal(kx, (2, 4, 16, 16), jnp.float32)

    w1, b1 = _init_conv_params(k1, 8, 4)
    w2, b2 = _init_conv_params(k2, 16, 8)
    w3, b3 = _init_conv_params(k3, 16, 16)

    backbone = OrderedDict([
        ("conv1", ("conv3x3", w1, b1)),
        ("relu1", ("relu",)),
        ("conv2", ("conv3x3", w2, b2)),
        ("relu2", ("relu",)),
        ("conv3", ("conv3x3", w3, b3)),
    ])
    return_layers = {"relu1": "feat1", "conv3": "feat3"}

    forward = make_get_intermediate_layers(backbone, return_layers, x.shape)
    out = forward(x)
    out = jax.tree_util.tree_map(jax.block_until_ready, out)

    # Reference (f32). The kernel feeds the MXU bf16 operands (f32 accumulation),
    # so tolerances cover bf16 rounding compounded across three conv layers.
    r1 = jnp.maximum(_conv_ref(x, w1, b1), 0.0)
    r2 = jnp.maximum(_conv_ref(r1, w2, b2), 0.0)
    r3 = _conv_ref(r2, w3, b3)
    assert out["feat1"].shape == (2, 8, 16, 16)
    assert out["feat3"].shape == (2, 16, 16, 16)
    assert jnp.allclose(out["feat1"], r1, atol=2e-2, rtol=2e-2)
    assert jnp.allclose(out["feat3"], r3, atol=2e-2, rtol=2e-2)

    print("KERNEL_OK")
</pallas_src>

<mosaic_0001>
module attributes {stable_mosaic.version = 11 : i64} {
  func.func @k(%arg0: memref<8x128xf32, #tpu.memory_space<vmem>>, %arg1: memref<8x128xf32, #tpu.memory_space<vmem>>) attributes {dimension_semantics = [], scalar_prefetch = 0 : i64, scratch_operands = 0 : i64, tpu.core_type = #tpu.core_type<tc>} {
    %c0 = arith.constant 0 : index
    %c0_0 = arith.constant 0 : index
    %0 = vector.load %arg0[%c0, %c0_0] : memref<8x128xf32, #tpu.memory_space<vmem>>, vector<8x128xf32>
    %c1_i32 = arith.constant 1 : i32
    %1 = tpu.dynamic_rotate %0 by %c1_i32 dim 1 : vector<8x128xf32>, i32 -> vector<8x128xf32>
    %c0_1 = arith.constant 0 : index
    %c0_2 = arith.constant 0 : index
    %2 = vector.load %arg1[%c0_1, %c0_2] : memref<8x128xf32, #tpu.memory_space<vmem>>, vector<8x128xf32>
    tpu.vector_store %arg1[%c0_1, %c0_2], %1 {strides = array<i32>} : memref<8x128xf32, #tpu.memory_space<vmem>>, vector<8x128xf32>,
    return
  }
}

</mosaic_0001>

<bundles_post_ra>
// kernel: tpu_custom_call.1
= control target key start
LH: loop header
LB: loop body
LE: loop exit
PB: predicated region body
PF: predicated region fallthrough
CT: control target
= control target key end

     0   :  { %6 = vsyncpa [#allocation3], 0  ;;  %s118_s0 = inlined_call_operand.hbm [shape: f32[8,128], index: 0, kind: input, shape index: {}]   ;;  %s119_s1 = inlined_call_operand.hbm [shape: f32[8,128], index: 1, kind: output, shape index: {}]  }
   0x1   :  { %7 = vsyncpa [#allocation4], 0  ;;  %s13_s8 = sshll.u32 %s118_s0, 4  ;;  %s99_s9 = smov [#allocation2]   ;;  %s14_s8 = int_to_ptr.hbm [resolvable:$true] %s13_s8 }
   0x2   :  { %s15_s10 = sshll.u32 %s99_s9, 4  ;;  %s16_s10 = int_to_ptr.vmem [resolvable:$true] %s15_s10 }
   0x3   :  { %18 = dma.hbm_to_vmem [thread:$0]  %s14_s8, 128, %s16_s10, [#allocation3]  }
   0x4   :  { %95 = dma.done.wait [#allocation3], 128  }
   0x5   :  { %96 = vsyncadd [#allocation3], 4294967168  ;;  %v23_v0 = vld [vmem:[#allocation2] sm:$0xff]  ;;  %s100_s11 = smov 1   ;;  %s101_s12 = smov [#allocation5]  }
   0x6   :  { %24 = vrot.lane.b32.xlu0 %v23_v0, %s100_s11  ;;  %s32_s13 = sshll.u32 %s101_s12, 4  ;;  %s34_s16 = sshll.u32 %s119_s1, 4  ;;  %s33_s13 = int_to_ptr.vmem [resolvable:$true] %s32_s13  ;;  %s35_s16 = int_to_ptr.hbm [resolvable:$true] %s34_s16 }
  0x78   :  { %v25_v1 = vpop.permute.xlu0 %24 }
  0x79   :  { %26 = vst [vmem:[#allocation5] sm:$0xff] %v25_v1 }
  0x7a   :  { %37 = dma.vmem_to_hbm [thread:$0]  %s33_s13, 128, %s35_s16, [#allocation4]  }
  0x7b   :  { %97 = dma.done.wait [#allocation4], 128  }
  0x7c   :  { %98 = vsyncadd [#allocation4], 4294967168 }
  0x7d   :  { %42 = vsyncpa [#allocation3], 1 }
  0x7e   :  { %43 = vsyncpa [#allocation4], 1 }

</bundles_post_ra>
